<compile_context>
chip_gen: v5e
topology: v5e:2x2
jax: 0.10.0
libtpu: 0.0.40
codegen_flags: <defaults>
</compile_context>

<pallas_src>
import jax
import jax.numpy as jnp
from jax import lax
from jax.experimental import pallas as pl
from jax.experimental.pallas import tpu as pltpu

LANE = 128
SUBLANE = 8


def _round_up(x: int, m: int) -> int:
    return ((x + m - 1) // m) * m


def _vmem_capacity_bytes() -> int:
    try:
        return int(pltpu.get_tpu_info().vmem_capacity_bytes)
    except Exception:
        return 64 << 20  # conservative fallback: v7x per-TensorCore VMEM


def _default_weight_dtype():
    """bf16 weights on v6e/v7x (native bf16 MXU/VPU), f32 on v5e and older."""
    try:
        kind = jax.devices()[0].device_kind.lower()
    except Exception:
        return jnp.float32
    if any(v in kind for v in ("v2", "v3", "v4", "v5")):
        return jnp.float32
    return jnp.bfloat16


def make_autoencoder_kernel(n_enc: int, n_dec: int):
    """Kernel closure for a fixed number of encoder/decoder Linear layers."""

    def kernel(*refs):
        # refs = [x_tile, (enc_w, enc_b)*n_enc, (dec_w, dec_b)*n_dec, x_bar_tile, z_tile]
        x_ref = refs[0]
        n_params = 2 * (n_enc + n_dec)
        param_refs = refs[1:1 + n_params]
        x_bar_ref = refs[1 + n_params]
        z_ref = refs[2 + n_params]

        h = x_ref[...]
        if h.dtype != jnp.float32:
            # Cast in-kernel (VPU op hidden under DMA); HBM stream stays in caller dtype.
            h = h.astype(jnp.float32)

        idx = 0
        # ----- encoder: Linear (+ ReLU on all but last layer) -----
        for i in range(n_enc):
            w = param_refs[idx][...]
            b = param_refs[idx + 1][...]  # biases always f32
            idx += 2
            h = jnp.dot(h.astype(w.dtype), w, preferred_element_type=jnp.float32) + b
            if i < n_enc - 1:
                h = jnp.maximum(h, 0.0)

        # ----- F.normalize(z, dim=-1): z / max(||z||, 1e-12) == z * rsqrt(max(sumsq, 1e-24)) -----
        sumsq = jnp.sum(h * h, axis=-1, keepdims=True)
        inv_norm = lax.rsqrt(jnp.maximum(sumsq, jnp.float32(1e-24)))
        z = h * inv_norm

        # Store z now to end its live range before the decoder loop (vreg/VMEM pressure).
        z_ref[...] = z.astype(z_ref.dtype)

        # ----- decoder: Linear (+ ReLU on all but last layer) -----
        out = z
        for i in range(n_dec):
            w = param_refs[idx][...]
            b = param_refs[idx + 1][...]
            idx += 2
            out = jnp.dot(out.astype(w.dtype), w, preferred_element_type=jnp.float32) + b
            if i < n_dec - 1:
                out = jnp.maximum(out, 0.0)

        x_bar_ref[...] = out.astype(x_bar_ref.dtype)

    return kernel


def _resident_spec(arr):
    # Constant index_map: same block every grid step -> stays VMEM-resident, no re-DMA.
    nd = arr.ndim
    return pl.BlockSpec(arr.shape, lambda i, _nd=nd: (0,) * _nd)


def _streamed_x_spec(tb, feat, buffered):
    if buffered:
        try:
            # Deeper input pipeline: compute per tile is tiny, so depth-2 leaves DMA
            # issue latency exposed (most visible on v7x's fast HBM).
            return pl.BlockSpec((tb, feat), lambda i: (i, 0),
                                pipeline_mode=pl.Buffered(3))
        except Exception:
            pass  # older jax without pipeline_mode -> default depth-2
    return pl.BlockSpec((tb, feat), lambda i: (i, 0))


def autoencoder_forward(x, enc_params, dec_params, *, batch_tile=512,
                        weight_dtype=None, out_dtype=None):
    """Full forward pass in one pallas_call with a batch-tiled, parallel grid.

    enc_params / dec_params: lists of (W, b) with W shape (in, out), b shape (1, out).
    Returns (x_bar, z) matching the PyTorch module's forward.
    """
    B, input_dim = x.shape
    z_dim = enc_params[-1][0].shape[1]
    if weight_dtype is None:
        weight_dtype = _default_weight_dtype()
    if out_dtype is None:
        out_dtype = x.dtype

    # ---- parameters at native widths (tiny, resident); weights optionally bf16, biases f32 ----
    flat_params = []
    for w, b in list(enc_params) + list(dec_params):
        flat_params.append(jnp.asarray(w, weight_dtype))
        flat_params.append(jnp.asarray(b, jnp.float32).reshape(1, -1))

    # ---- batch tile: large for DMA efficiency, but keep >= 2 tiles when B allows so both
    #      v7x TensorCores get work on the "parallel" axis (overhead per step ~0.35us). ----
    tb = max(SUBLANE, _round_up(min(batch_tile, _round_up(B, SUBLANE)), SUBLANE))
    if B >= 2 * SUBLANE:
        tb = min(tb, _round_up(pl.cdiv(B, 2), SUBLANE))
    num_tiles = pl.cdiv(B, tb)
    # Partial last tile: Pallas pads the block; rows are independent and OOB writes dropped.

    buffered = num_tiles >= 3
    in_specs = [_streamed_x_spec(tb, input_dim, buffered)]
    in_specs += [_resident_spec(p) for p in flat_params]
    out_specs = [
        pl.BlockSpec((tb, input_dim), lambda i: (i, 0)),
        pl.BlockSpec((tb, z_dim), lambda i: (i, 0)),
    ]
    out_shape = (
        jax.ShapeDtypeStruct((B, input_dim), out_dtype),
        jax.ShapeDtypeStruct((B, z_dim), out_dtype),
    )

    # ---- VMEM budget: resident weights + buffered streamed tiles + live activations,
    #      clamped to a generation-aware fraction of physical VMEM. ----
    weight_bytes = sum(int(p.size) * p.dtype.itemsize for p in flat_params)
    max_feat = max([input_dim, z_dim] +
                   [int(w.shape[1]) for w, _ in list(enc_params) + list(dec_params)])
    in_bufs = 3 if buffered else 2
    stream_bytes = (in_bufs * tb * input_dim * jnp.dtype(x.dtype).itemsize
                    + 2 * tb * (input_dim + z_dim) * jnp.dtype(out_dtype).itemsize)
    act_bytes = 6 * tb * max_feat * 4  # live f32 activations / compiler temporaries
    est = weight_bytes + stream_bytes + act_bytes + (4 << 20)
    cap = int(0.75 * _vmem_capacity_bytes())  # ~48 MiB on v7x, ~96 MiB on v5e/v6e
    vmem_bytes = int(min(max(est, 32 << 20), cap))

    kernel = make_autoencoder_kernel(len(enc_params), len(dec_params))

    x_bar, z = pl.pallas_call(
        kernel,
        grid=(num_tiles,),
        in_specs=in_specs,
        out_specs=out_specs,
        out_shape=out_shape,
        compiler_params=pltpu.CompilerParams(
            dimension_semantics=("parallel",),
            vmem_limit_bytes=vmem_bytes,
        ),
    )(x, *flat_params)

    return x_bar, z


def init_linear(key, in_dim, out_dim):
    """Deterministic init mimicking torch.nn.Linear (uniform +/- 1/sqrt(in)), pre-transposed."""
    kw, kb = jax.random.split(key)
    bound = 1.0 / jnp.sqrt(jnp.float32(in_dim))
    w = jax.random.uniform(kw, (in_dim, out_dim), jnp.float32, -bound, bound)
    b = jax.random.uniform(kb, (1, out_dim), jnp.float32, -bound, bound)
    return w, b


def reference_forward(x, enc_params, dec_params):
    h = x
    for i, (w, b) in enumerate(enc_params):
        h = h @ w + b
        if i < len(enc_params) - 1:
            h = jnp.maximum(h, 0.0)
    norm = jnp.sqrt(jnp.sum(h * h, axis=-1, keepdims=True))
    z = h / jnp.maximum(norm, 1e-12)
    out = z
    for i, (w, b) in enumerate(dec_params):
        out = out @ w + b
        if i < len(dec_params) - 1:
            out = jnp.maximum(out, 0.0)
    return out, z


if __name__ == "__main__":
    input_dim = 32
    hidden_dims = [32, 16]  # encoder: 32 -> 32 -> 16 ; decoder: 16 -> 32 -> 32

    key = jax.random.PRNGKey(0)
    keys = jax.random.split(key, 10)

    enc_dims = [input_dim] + hidden_dims
    enc_params = [init_linear(keys[i], enc_dims[i], enc_dims[i + 1])
                  for i in range(len(enc_dims) - 1)]

    rev_hidden = list(reversed(hidden_dims))  # PyTorch code reverses hidden_dims in-place
    dec_dims = rev_hidden + [input_dim]
    dec_params = [init_linear(keys[4 + i], dec_dims[i], dec_dims[i + 1])
                  for i in range(len(dec_dims) - 1)]

    # 1) Small batch, explicit f32 weights -> tight numerical check (single grid step).
    x_small = jax.random.normal(keys[7], (8, input_dim), jnp.float32)
    x_bar, z = autoencoder_forward(x_small, enc_params, dec_params,
                                   weight_dtype=jnp.float32)
    jax.block_until_ready((x_bar, z))
    x_bar_ref, z_ref = reference_forward(x_small, enc_params, dec_params)
    assert x_bar.shape == x_small.shape and z.shape == (8, hidden_dims[-1])
    assert jnp.allclose(x_bar, x_bar_ref, atol=1e-5, rtol=1e-5)
    assert jnp.allclose(z, z_ref, atol=1e-5, rtol=1e-5)

    # 2) B=512 -> two 256-row parallel tiles (both v7x TCs busy), f32 weights, tight check.
    x_big = jax.random.normal(keys[8], (512, input_dim), jnp.float32)
    x_bar_b, z_b = autoencoder_forward(x_big, enc_params, dec_params,
                                       weight_dtype=jnp.float32)
    jax.block_until_ready((x_bar_b, z_b))
    x_bar_b_ref, z_b_ref = reference_forward(x_big, enc_params, dec_params)
    assert jnp.allclose(x_bar_b, x_bar_b_ref, atol=1e-5, rtol=1e-5)
    assert jnp.allclose(z_b, z_b_ref, atol=1e-5, rtol=1e-5)

    # 3) B=2048 -> four 512-row tiles (exercises Buffered(3) input pipelining) with the
    #    per-chip default weight dtype (bf16 on v6e/v7x) -> looser tolerance.
    x_deep = jax.random.normal(keys[9], (2048, input_dim), jnp.float32)
    x_bar_d, z_d = autoencoder_forward(x_deep, enc_params, dec_params)
    jax.block_until_ready((x_bar_d, z_d))
    x_bar_d_ref, z_d_ref = reference_forward(x_deep, enc_params, dec_params)
    assert jnp.allclose(x_bar_d, x_bar_d_ref, atol=5e-2, rtol=5e-2)
    assert jnp.allclose(z_d, z_d_ref, atol=5e-2, rtol=5e-2)

    print("KERNEL_OK")
</pallas_src>

<mosaic_0001>
module attributes {stable_mosaic.version = 11 : i64} {
  func.func @kernel(%arg0: i32, %arg1: memref<8x32xf32, #tpu.memory_space<vmem>>, %arg2: memref<32x32xf32, #tpu.memory_space<vmem>>, %arg3: memref<1x32xf32, #tpu.memory_space<vmem>>, %arg4: memref<32x16xf32, #tpu.memory_space<vmem>>, %arg5: memref<1x16xf32, #tpu.memory_space<vmem>>, %arg6: memref<16x32xf32, #tpu.memory_space<vmem>>, %arg7: memref<1x32xf32, #tpu.memory_space<vmem>>, %arg8: memref<32x32xf32, #tpu.memory_space<vmem>>, %arg9: memref<1x32xf32, #tpu.memory_space<vmem>>, %arg10: memref<8x32xf32, #tpu.memory_space<vmem>>, %arg11: memref<8x16xf32, #tpu.memory_space<vmem>>) attributes {dimension_semantics = [#tpu.dimension_semantics<parallel>], iteration_bounds = array<i64: 1>, scalar_prefetch = 0 : i64, scratch_operands = 0 : i64, tpu.core_type = #tpu.core_type<tc>, window_params = [{transform_indices = @transform_0, window_bounds = array<i64: 8, 32>}, {pipeline_mode = #tpu.pipeline_mode<synchronous>, transform_indices = @transform_1, window_bounds = array<i64: 32, 32>}, {pipeline_mode = #tpu.pipeline_mode<synchronous>, transform_indices = @transform_2, window_bounds = array<i64: 1, 32>}, {pipeline_mode = #tpu.pipeline_mode<synchronous>, transform_indices = @transform_3, window_bounds = array<i64: 32, 16>}, {pipeline_mode = #tpu.pipeline_mode<synchronous>, transform_indices = @transform_4, window_bounds = array<i64: 1, 16>}, {pipeline_mode = #tpu.pipeline_mode<synchronous>, transform_indices = @transform_5, window_bounds = array<i64: 16, 32>}, {pipeline_mode = #tpu.pipeline_mode<synchronous>, transform_indices = @transform_6, window_bounds = array<i64: 1, 32>}, {pipeline_mode = #tpu.pipeline_mode<synchronous>, transform_indices = @transform_7, window_bounds = array<i64: 32, 32>}, {pipeline_mode = #tpu.pipeline_mode<synchronous>, transform_indices = @transform_8, window_bounds = array<i64: 1, 32>}, {transform_indices = @transform_9, window_bounds = array<i64: 8, 32>}, {transform_indices = @transform_10, window_bounds = array<i64: 8, 16>}]} {
    %c0 = arith.constant 0 : index
    %c0_0 = arith.constant 0 : index
    %0 = vector.load %arg1[%c0, %c0_0] : memref<8x32xf32, #tpu.memory_space<vmem>>, vector<8x32xf32>
    %c0_1 = arith.constant 0 : index
    %c0_2 = arith.constant 0 : index
    %1 = vector.load %arg2[%c0_1, %c0_2] : memref<32x32xf32, #tpu.memory_space<vmem>>, vector<32x32xf32>
    %c0_3 = arith.constant 0 : index
    %c0_4 = arith.constant 0 : index
    %2 = vector.load %arg3[%c0_3, %c0_4] : memref<1x32xf32, #tpu.memory_space<vmem>>, vector<1x32xf32>
    %cst = arith.constant dense<0.000000e+00> : vector<8x32xf32>
    %3 = tpu.matmul %0, %1, %cst {dimension_numbers = #tpu.dot_dimension_numbers<[1], [0], [0], [1], [0, 0, 1, 1], [], []>} : vector<8x32xf32>, vector<32x32xf32>, vector<8x32xf32> -> vector<8x32xf32>
    %4 = vector.broadcast %2 : vector<1x32xf32> to vector<8x32xf32>
    %5 = arith.addf %3, %4 : vector<8x32xf32>
    %cst_5 = arith.constant 0.000000e+00 : f32
    %6 = vector.broadcast %cst_5 : f32 to vector<8x32xf32>
    %7 = arith.maximumf %5, %6 : vector<8x32xf32>
    %c0_6 = arith.constant 0 : index
    %c0_7 = arith.constant 0 : index
    %8 = vector.load %arg4[%c0_6, %c0_7] : memref<32x16xf32, #tpu.memory_space<vmem>>, vector<32x16xf32>
    %c0_8 = arith.constant 0 : index
    %c0_9 = arith.constant 0 : index
    %9 = vector.load %arg5[%c0_8, %c0_9] : memref<1x16xf32, #tpu.memory_space<vmem>>, vector<1x16xf32>
    %cst_10 = arith.constant dense<0.000000e+00> : vector<8x16xf32>
    %10 = tpu.matmul %7, %8, %cst_10 {dimension_numbers = #tpu.dot_dimension_numbers<[1], [0], [0], [1], [0, 0, 1, 1], [], []>} : vector<8x32xf32>, vector<32x16xf32>, vector<8x16xf32> -> vector<8x16xf32>
    %11 = vector.broadcast %9 : vector<1x16xf32> to vector<8x16xf32>
    %12 = arith.addf %10, %11 : vector<8x16xf32>
    %13 = arith.mulf %12, %12 : vector<8x16xf32>
    %cst_11 = arith.constant dense<0.000000e+00> : vector<8xf32>
    %14 = vector.multi_reduction <add>, %13, %cst_11 [1] : vector<8x16xf32> to vector<8xf32>
    %15 = vector.shape_cast %14 : vector<8xf32> to vector<8x1xf32>
    %cst_12 = arith.constant 1.000000e-24 : f32
    %16 = vector.broadcast %cst_12 : f32 to vector<8x1xf32>
    %17 = arith.maximumf %15, %16 : vector<8x1xf32>
    %18 = math.rsqrt %17 : vector<8x1xf32>
    %19 = vector.broadcast %18 : vector<8x1xf32> to vector<8x16xf32>
    %20 = arith.mulf %12, %19 : vector<8x16xf32>
    %c0_13 = arith.constant 0 : index
    %c0_14 = arith.constant 0 : index
    %21 = vector.load %arg11[%c0_13, %c0_14] : memref<8x16xf32, #tpu.memory_space<vmem>>, vector<8x16xf32>
    tpu.vector_store %arg11[%c0_13, %c0_14], %20 {strides = array<i32>} : memref<8x16xf32, #tpu.memory_space<vmem>>, vector<8x16xf32>,
    %c0_15 = arith.constant 0 : index
    %c0_16 = arith.constant 0 : index
    %22 = vector.load %arg6[%c0_15, %c0_16] : memref<16x32xf32, #tpu.memory_space<vmem>>, vector<16x32xf32>
    %c0_17 = arith.constant 0 : index
    %c0_18 = arith.constant 0 : index
    %23 = vector.load %arg7[%c0_17, %c0_18] : memref<1x32xf32, #tpu.memory_space<vmem>>, vector<1x32xf32>
    %cst_19 = arith.constant dense<0.000000e+00> : vector<8x32xf32>
    %24 = tpu.matmul %20, %22, %cst_19 {dimension_numbers = #tpu.dot_dimension_numbers<[1], [0], [0], [1], [0, 0, 1, 1], [], []>} : vector<8x16xf32>, vector<16x32xf32>, vector<8x32xf32> -> vector<8x32xf32>
    %25 = vector.broadcast %23 : vector<1x32xf32> to vector<8x32xf32>
    %26 = arith.addf %24, %25 : vector<8x32xf32>
    %cst_20 = arith.constant 0.000000e+00 : f32
    %27 = vector.broadcast %cst_20 : f32 to vector<8x32xf32>
    %28 = arith.maximumf %26, %27 : vector<8x32xf32>
    %c0_21 = arith.constant 0 : index
    %c0_22 = arith.constant 0 : index
    %29 = vector.load %arg8[%c0_21, %c0_22] : memref<32x32xf32, #tpu.memory_space<vmem>>, vector<32x32xf32>
    %c0_23 = arith.constant 0 : index
    %c0_24 = arith.constant 0 : index
    %30 = vector.load %arg9[%c0_23, %c0_24] : memref<1x32xf32, #tpu.memory_space<vmem>>, vector<1x32xf32>
    %cst_25 = arith.constant dense<0.000000e+00> : vector<8x32xf32>
    %31 = tpu.matmul %28, %29, %cst_25 {dimension_numbers = #tpu.dot_dimension_numbers<[1], [0], [0], [1], [0, 0, 1, 1], [], []>} : vector<8x32xf32>, vector<32x32xf32>, vector<8x32xf32> -> vector<8x32xf32>
    %32 = vector.broadcast %30 : vector<1x32xf32> to vector<8x32xf32>
    %33 = arith.addf %31, %32 : vector<8x32xf32>
    %c0_26 = arith.constant 0 : index
    %c0_27 = arith.constant 0 : index
    %34 = vector.load %arg10[%c0_26, %c0_27] : memref<8x32xf32, #tpu.memory_space<vmem>>, vector<8x32xf32>
    tpu.vector_store %arg10[%c0_26, %c0_27], %33 {strides = array<i32>} : memref<8x32xf32, #tpu.memory_space<vmem>>, vector<8x32xf32>,
    return
  }
  func.func @transform_0(%arg0: i32) -> (i32, i32) {
    %c0_i32 = arith.constant 0 : i32
    %c0_i32_0 = arith.constant 0 : i32
    return %arg0, %c0_i32 : i32, i32
  }
  func.func @transform_1(%arg0: i32) -> (i32, i32) {
    %c0_i32 = arith.constant 0 : i32
    %c0_i32_0 = arith.constant 0 : i32
    %c0_i32_1 = arith.constant 0 : i32
    return %c0_i32, %c0_i32_0 : i32, i32
  }
  func.func @transform_2(%arg0: i32) -> (i32, i32) {
    %c0_i32 = arith.constant 0 : i32
    %c0_i32_0 = arith.constant 0 : i32
    %c0_i32_1 = arith.constant 0 : i32
    return %c0_i32, %c0_i32_0 : i32, i32
  }
  func.func @transform_3(%arg0: i32) -> (i32, i32) {
    %c0_i32 = arith.constant 0 : i32
    %c0_i32_0 = arith.constant 0 : i32
    %c0_i32_1 = arith.constant 0 : i32
    return %c0_i32, %c0_i32_0 : i32, i32
  }
  func.func @transform_4(%arg0: i32) -> (i32, i32) {
    %c0_i32 = arith.constant 0 : i32
    %c0_i32_0 = arith.constant 0 : i32
    %c0_i32_1 = arith.constant 0 : i32
    return %c0_i32, %c0_i32_0 : i32, i32
  }
  func.func @transform_5(%arg0: i32) -> (i32, i32) {
    %c0_i32 = arith.constant 0 : i32
    %c0_i32_0 = arith.constant 0 : i32
    %c0_i32_1 = arith.constant 0 : i32
    return %c0_i32, %c0_i32_0 : i32, i32
  }
  func.func @transform_6(%arg0: i32) -> (i32, i32) {
    %c0_i32 = arith.constant 0 : i32
    %c0_i32_0 = arith.constant 0 : i32
    %c0_i32_1 = arith.constant 0 : i32
    return %c0_i32, %c0_i32_0 : i32, i32
  }
  func.func @transform_7(%arg0: i32) -> (i32, i32) {
    %c0_i32 = arith.constant 0 : i32
    %c0_i32_0 = arith.constant 0 : i32
    %c0_i32_1 = arith.constant 0 : i32
    return %c0_i32, %c0_i32_0 : i32, i32
  }
  func.func @transform_8(%arg0: i32) -> (i32, i32) {
    %c0_i32 = arith.constant 0 : i32
    %c0_i32_0 = arith.constant 0 : i32
    %c0_i32_1 = arith.constant 0 : i32
    return %c0_i32, %c0_i32_0 : i32, i32
  }
  func.func @transform_9(%arg0: i32) -> (i32, i32) {
    %c0_i32 = arith.constant 0 : i32
    %c0_i32_0 = arith.constant 0 : i32
    return %arg0, %c0_i32 : i32, i32
  }
  func.func @transform_10(%arg0: i32) -> (i32, i32) {
    %c0_i32 = arith.constant 0 : i32
    %c0_i32_0 = arith.constant 0 : i32
    return %arg0, %c0_i32 : i32, i32
  }
}

</mosaic_0001>

<bundles_post_ra>
// kernel: tpu_custom_call.1
= control target key start
LH: loop header
LB: loop body
LE: loop exit
PB: predicated region body
PF: predicated region fallthrough
CT: control target
= control target key end

     0   :  { %16 = vsyncpa [#allocation3], 0  ;;  %s487_s0 = inlined_call_operand.hbm [shape: f32[8,32], index: 0, kind: input, shape index: {}]   ;;  %s488_s1 = inlined_call_operand.vmem [shape: f32[32,32], index: 1, kind: input, shape index: {}]   ;;  %s489_s2 = inlined_call_operand.vmem [shape: f32[1,32], index: 2, kind: input, shape index: {}]   ;;  %s490_s3 = inlined_call_operand.vmem [shape: f32[32,16], index: 3, kind: input, shape index: {}]   ;;  %s491_s4 = inlined_call_operand.vmem [shape: f32[1,16], index: 4, kind: input, shape index: {}]   ;;  %s492_s5 = inlined_call_operand.vmem [shape: f32[16,32], index: 5, kind: input, shape index: {}]   ;;  %s493_s6 = inlined_call_operand.vmem [shape: f32[1,32], index: 6, kind: input, shape index: {}]   ;;  %s494_s7 = inlined_call_operand.hbm [shape: f32[32,32], index: 7, kind: input, shape index: {}]   ;;  %s495_s8 = inlined_call_operand.vmem [shape: f32[1,32], index: 8, kind: input, shape index: {}]   ;;  %s496_s9 = inlined_call_operand.hbm [shape: f32[8,32], index: 9, kind: output, shape index: {0}]   ;;  %s497_s10 = inlined_call_operand.hbm [shape: f32[8,16], index: 10, kind: output, shape index: {1}]  }
   0x1   :  { %17 = vsyncpa [#allocation6], 0 }
   0x2   :  { %18 = vsyncpa [#allocation4], 0 }
   0x3   :  { %19 = vsyncpa [#allocation9], 0  ;;  %s25_s15 = sshll.u32 %s487_s0, 4  ;;  %s365_s16 = smov [#allocation2]   ;;  %s26_s15 = int_to_ptr.hbm [resolvable:$true] %s25_s15 }
   0x4   :  { %s27_s17 = sshll.u32 %s365_s16, 4  ;;  %s47_s20 = sshll.u32 %s494_s7, 4  ;;  %s28_s17 = int_to_ptr.vmem [resolvable:$true] %s27_s17  ;;  %s48_s20 = int_to_ptr.hbm [resolvable:$true] %s47_s20 }
   0x5   :  { %30 = dma.hbm_to_vmem [thread:$0]  %s26_s15, 128, %s28_s17, [#allocation3]  }
   0x6   :  { %s366_s21 = smov [#allocation5]   ;;  %s367_s23 = smov 128  }
   0x7   :  { %s49_s22 = sshll.u32 %s366_s21, 4  ;;  %s368_s24 = smov 8   ;;  %s50_s22 = int_to_ptr.vmem [resolvable:$true] %s49_s22 }
   0x8   :  { %55 = dma.hbm_to_vmem [thread:$0]  %s48_s20, 512, %s50_s22, [#allocation6], %s367_s23, %s367_s23, %s368_s24  }
   0x9   :  { %357 = dma.done.wait [#allocation3], 128  }
   0xa   :  { %358 = vsyncadd [#allocation3], 4294967168 }
   0xb   :  { %359 = dma.done.wait [#allocation6], 512  }
   0xc   :  { %360 = vsyncadd [#allocation6], 4294966784  ;;  %v70_v0 = vld [vmem:[%s488_s1 + $0x18] sm:$0xff]  ;;  %v69_v1 = vld [vmem:[%s488_s1 + $0x10] sm:$0xff]  ;;  %vm75_vm0 = vcmask 261120   ;;  %vm132_vm1 = vcmask 130048  }
   0xd   :  { %91 = vmatpush.msra.mxu0 %v70_v0  ;;  %v103_v2 = vld [vmem:[%s490_s3 + $0x18] sm:$0xff]  ;;  %v68_v3 = vld [vmem:[%s488_s1 + $0x8] sm:$0xff]  ;;  %v67_v4 = vld [vmem:[%s488_s1] sm:$0xff]  ;;  %s369_s24 = smov [#allocation8]   ;;  %s229_s27 = sshll.u32 %s497_s10, 4  ;;  %s230_s27 = int_to_ptr.hbm [resolvable:$true] %s229_s27 }
   0xe   :  { %123 = vmatpush.msra.mxu1 %v103_v2  ;;  %v66_v5 = vld [vmem:[#allocation2] sm:$0xff]  ;;  %v102_v6 = vld [vmem:[%s490_s3 + $0x10] sm:$0xff]  ;;  %v101_v7 = vld [vmem:[%s490_s3 + $0x8] sm:$0xff]  ;;  %s227_s0 = sshll.u32 %s369_s24, 4  ;;  %s370_s29 = smov [#allocation7]   ;;  %s228_s0 = int_to_ptr.vmem [resolvable:$true] %s227_s0 }
   0xf   :  { %92 = vmatpush.msra.mxu0 %v69_v1  ;;  %v100_v8 = vld [vmem:[%s490_s3] sm:$0xff]  ;;  %v150_v18 = vld [vmem:[%s492_s5 + $0x8] sm:$0xff]  ;;  %v181_v31 = vld [vmem:[#allocation5 + $0x10] sm:$0xff]  ;;  %s218_s12 = sshll.u32 %s496_s9, 4  ;;  %s219_s12 = int_to_ptr.hbm [resolvable:$true] %s218_s12 }
  0x10   :  { %124 = vmatpush.msra.mxu1 %v102_v6  ;;  %v255_v9 = vld [vmem:[%s489_s2] ss:$0 sm:$0xff]  ;;  %172 = vmatpush.msra.mxu2 %v150_v18  ;;  %v180_v32 = vld [vmem:[#allocation5 + $0x8] sm:$0xff]  ;;  %v179_v33 = vld [vmem:[#allocation5] sm:$0xff] }
  0x11   :  { %93 = vmatpush.msra.mxu0 %v68_v3  ;;  %v256_v13 = vld [vmem:[%s491_s4] ss:$0 sm:$0xff] }
  0x12   :  { %125 = vmatpush.msra.mxu1 %v101_v7  ;;  %v149_v19 = vld [vmem:[%s492_s5] sm:$0xff] }
  0x13   :  { %94 = vmatpush.msra.mxu0 %v67_v4  ;;  %173 = vmatpush.msra.mxu2 %v149_v19  ;;  %v182_v20 = vld [vmem:[#allocation5 + $0x18] sm:$0xff] }
  0x14   :  { %245 = vmatmul.msk.f32.vlgmr.msra.gmra.mxu0 %vm75_vm0, %v66_v5  ;;  %126 = vmatpush.msra.mxu1 %v100_v8  ;;  %v257_v34 = vld [vmem:[%s493_s6] ss:$0 sm:$0xff]  ;;  %s216_s6 = sshll.u32 %s370_s29, 4  ;;  %s217_s6 = int_to_ptr.vmem [resolvable:$true] %s216_s6 }
  0x15   :  { %202 = vmatpush.msra.mxu3 %v182_v20  ;;  %v258_v38 = vld [vmem:[%s495_s8] ss:$0 sm:$0xff] }
  0x17   :  { %203 = vmatpush.msra.mxu3 %v181_v31 }
  0x19   :  { %204 = vmatpush.msra.mxu3 %v180_v32 }
  0x1b   :  { %205 = vmatpush.msra.mxu3 %v179_v33 }
  0x91   :  { %v96_v10 = vpop.f32.mrf.mxu0 }
  0x92   :  { %v97_v11 = vadd.f32 %v255_v9, %v96_v10 }
  0x94   :  { %v99_v12 = vmax.f32 %v97_v11, 0.0 }
  0x96   :  { %246 = vmatmul.msk.f32.vlgmr.msra.gmra.mxu1 %vm75_vm0, %v99_v12 }
 0x113   :  { %v128_v14 = vpop.f32.mrf.mxu1 }
 0x114   :  { %v129_v15 = vadd.f32 %v256_v13, %v128_v14 }
 0x116   :  { %v131_v16 = vmul.f32 %v129_v15, %v129_v15 }
 0x118   :  { %v133_v17 = vsel %vm132_vm1, %v131_v16, 0.0 }
 0x119   :  { %134 = vadd.xlane.f32.xlu0 %v133_v17 }
 0x18c   :  { %v135_v21 = vpop.xlane.xlu0 %134 }
 0x18d   :  { %v136_v22 = vmax.f32 %v135_v21, 1e-24 }
 0x18f   :  { %259 = vrsqrt.f32 %v136_v22  ;;  %vm143_vm3 = vweird.f32 %v136_v22 }
 0x195   :  { %v260_v23 = vpop.eup %259 }
 0x196   :  { %v138_v24 = vmul.f32 %v260_v23, %v136_v22  ;;  %vm144_vm2 = vweird.f32 %v260_v23 }
 0x197   :  { %vm145_vm4 = vmor %vm143_vm3, %vm144_vm2 }
 0x198   :  { %v139_v25 = vmul.f32 %v260_v23, %v138_v24 }
 0x19a   :  { %v140_v26 = vmul.f32 0.5, %v139_v25 }
 0x19c   :  { %v141_v27 = vsub.f32 1.5, %v140_v26 }
 0x19e   :  { %v142_v28 = vmul.f32 %v260_v23, %v141_v27 }
 0x1a0   :  { %v146_v29 = vsel %vm145_vm4, %v260_v23, %v142_v28 }
 0x1a1   :  { %v147_v30 = vmul.f32 %v146_v29, %v129_v15 }
 0x1a3   :  { %247 = vmatmul.msk.f32.vlgmr.msra.gmra.mxu2 %vm132_vm1, %v147_v30  ;;  %148 = vst.msk [vmem:[#allocation8] sm:$0xff] %vm132_vm1, %v147_v30 }
 0x1a4   :  { %232 = dma.vmem_to_hbm [thread:$0]  %s228_s0, 128, %s230_s27, [#allocation9]  }
 0x226   :  { %v175_v35 = vpop.f32.mrf.mxu2 }
 0x227   :  { %v176_v36 = vadd.f32 %v257_v34, %v175_v35 }
 0x229   :  { %v178_v37 = vmax.f32 %v176_v36, 0.0 }
 0x22b   :  { %248 = vmatmul.msk.f32.vlgmr.msra.gmra.mxu3 %vm75_vm0, %v178_v37 }
 0x2ae   :  { %v207_v39 = vpop.f32.mrf.mxu3 }
 0x2af   :  { %v208_v40 = vadd.f32 %v258_v38, %v207_v39 }
 0x2b1   :  { %210 = vst.msk [vmem:[#allocation7] sm:$0xff] %vm75_vm0, %v208_v40 }
 0x2b2   :  { %221 = dma.vmem_to_hbm [thread:$0]  %s217_s6, 128, %s219_s12, [#allocation4]  }
 0x2b3   :  { %361 = dma.done.wait [#allocation4], 128  }
 0x2b4   :  { %362 = vsyncadd [#allocation4], 4294967168 }
 0x2b5   :  { %363 = dma.done.wait [#allocation9], 128  }
 0x2b6   :  { %364 = vsyncadd [#allocation9], 4294967168 }
 0x2b7   :  { %241 = vsyncpa [#allocation3], 1 }
 0x2b8   :  { %242 = vsyncpa [#allocation6], 1 }
 0x2b9   :  { %243 = vsyncpa [#allocation4], 1 }
 0x2ba   :  { %244 = vsyncpa [#allocation9], 1 }

</bundles_post_ra>
